<compile_context>
chip_gen: v6e
topology: v6e:2x2x1
jax: 0.10.0
libtpu: 0.0.40
codegen_flags: <defaults>
</compile_context>

<pallas_src>
from typing import Any, Dict, List, Optional

import jax
import jax.numpy as jnp
from jax.experimental import pallas as pl
from jax.experimental.pallas import tpu as pltpu


def _make_hbm_copy_kernel(chunk_starts, chunk_sizes):
    """Kernel body: HBM->HBM DMA copy with `len(chunk_starts)` DMAs in flight."""
    n = len(chunk_starts)

    def kernel(x_hbm, o_hbm, sems):
        if n == 1:
            # Single DMA over the full refs (also covers 0-d / tiny arrays).
            cp = pltpu.make_async_copy(x_hbm, o_hbm, sems.at[0])
            cp.start()
            cp.wait()
            return
        copies = []
        for c in range(n):
            sl = pl.ds(chunk_starts[c], chunk_sizes[c])   # static leading-dim slice
            cp = pltpu.make_async_copy(x_hbm.at[sl], o_hbm.at[sl], sems.at[c])
            cp.start()
            copies.append(cp)
        for cp in copies:
            cp.wait()

    return kernel


def materialized_copy(
    x: jnp.ndarray,
    *,
    max_inflight_dmas: int = 4,
    min_chunk_bytes: int = 1 << 20,
) -> jnp.ndarray:
    """Fresh-buffer copy of `x` as a pure HBM->HBM DMA (no VMEM staging)."""
    if x.size == 0:
        return x  # nothing to copy

    itemsize = jnp.dtype(x.dtype).itemsize
    nbytes = int(x.size) * itemsize

    # Split the leading dim into a few chunks so several DMAs are in flight
    # (only worth doing once each chunk is reasonably large).
    leading = 1 if x.ndim == 0 else int(x.shape[0])
    num_chunks = max(
        1,
        min(max_inflight_dmas, leading, nbytes // max(int(min_chunk_bytes), 1)),
    )

    base, rem = divmod(leading, num_chunks)
    starts, sizes = [], []
    s = 0
    for c in range(num_chunks):
        sz = base + (1 if c < rem else 0)
        starts.append(s)
        sizes.append(sz)
        s += sz

    kernel = _make_hbm_copy_kernel(tuple(starts), tuple(sizes))

    # TODO(synk): on v7x (2 TensorCores) a "parallel" grid over the chunks would
    # let both cores' DMA engines participate for very large arrays.
    return pl.pallas_call(
        kernel,
        out_shape=jax.ShapeDtypeStruct(x.shape, x.dtype),
        in_specs=[pl.BlockSpec(memory_space=pl.ANY)],
        out_specs=pl.BlockSpec(memory_space=pl.ANY),
        scratch_shapes=[pltpu.SemaphoreType.DMA((num_chunks,))],
        compiler_params=pltpu.CompilerParams(has_side_effects=True),
        cost_estimate=pl.CostEstimate(
            flops=0, transcendentals=0, bytes_accessed=2 * nbytes
        ),
    )(x)


class BaseDynamicBackbone:
    """JAX/Pallas mirror of the abstract PyTorch BaseDynamicBackbone."""

    def __init__(self, device: Optional[Any] = None):
        # Mirrors the reference ctor (stores the device); no own parameters.
        self.device = device

    def forward(self, snapshots_data: List[Dict[str, jnp.ndarray]], **kwargs) -> Any:
        # TODO(synk): abstract in the reference module — subclasses define the
        # actual dynamic-graph backbone compute; nothing to lower to Pallas here.
        raise NotImplementedError("Subclasses must implement the forward method.")

    def __call__(self, *args, **kwargs):
        return self.forward(*args, **kwargs)

    def get_final_node_representations(
        self, model_output: Any, *, materialize: bool = False
    ) -> jnp.ndarray:
        if isinstance(model_output, jnp.ndarray):
            if materialize:
                # Explicitly-requested fresh buffer: HBM->HBM DMA copy.
                return materialized_copy(model_output)
            # Identity semantics == no work: return the array as-is
            # (zero HBM traffic; this is the recommended fast path).
            return model_output
        raise NotImplementedError(
            "Subclasses must implement get_final_node_representations if "
            "forward does not directly return node representations."
        )

    def reset_parameters(self):
        # Base class has no child modules with parameters; no-op (matches ref).
        pass


if __name__ == "__main__":
    key = jax.random.PRNGKey(0)
    backbone = BaseDynamicBackbone(device=jax.devices()[0])

    # --- abstract forward contract ------------------------------------------------
    snapshots_data = [{"node_features": jnp.zeros((4, 4), jnp.float32)}]
    try:
        backbone.forward(snapshots_data)
        raise AssertionError("forward should have raised NotImplementedError")
    except NotImplementedError:
        pass

    k1, k2, k3 = jax.random.split(key, 3)

    # --- case 1: f32 node representations, lane-aligned shape (single DMA) --------
    x_f32 = jax.random.normal(k1, (256, 128), dtype=jnp.float32)
    fast = backbone.get_final_node_representations(x_f32)  # zero-copy default path
    assert fast is x_f32
    out_f32 = jax.block_until_ready(
        backbone.get_final_node_representations(x_f32, materialize=True)
    )
    assert out_f32.shape == x_f32.shape and out_f32.dtype == x_f32.dtype
    assert bool(jnp.all(out_f32 == x_f32))

    # --- case 2: bf16, ragged shape; copied in native shape (no relayout) ---------
    x_bf16 = jax.random.normal(k2, (200, 96), dtype=jnp.float32).astype(jnp.bfloat16)
    out_bf16 = jax.block_until_ready(
        backbone.get_final_node_representations(x_bf16, materialize=True)
    )
    assert out_bf16.shape == x_bf16.shape and out_bf16.dtype == x_bf16.dtype
    assert bool(jnp.all(out_bf16 == x_bf16))

    # --- case 3: 3-D output + multi-chunk DMA path (forced small chunks) ----------
    x_3d = jax.random.normal(k3, (2, 8, 32), dtype=jnp.float32)
    out_3d = jax.block_until_ready(materialized_copy(x_3d, min_chunk_bytes=1))
    assert out_3d.shape == x_3d.shape and out_3d.dtype == x_3d.dtype
    assert bool(jnp.all(out_3d == x_3d))

    # --- case 4: ragged leading dim split into 3 in-flight DMAs -------------------
    x_chunk = jax.random.normal(key, (64, 32), dtype=jnp.float32)
    out_chunk = jax.block_until_ready(
        materialized_copy(x_chunk, max_inflight_dmas=3, min_chunk_bytes=1)
    )
    assert bool(jnp.all(out_chunk == x_chunk))

    print("KERNEL_OK")
</pallas_src>

<mosaic_0001>
module attributes {stable_mosaic.version = 11 : i64} {
  func.func @kernel(%arg0: memref<256x128xf32, #tpu.memory_space<any>>, %arg1: memref<256x128xf32, #tpu.memory_space<any>>, %arg2: memref<1x!tpu.dma_semaphore, #tpu.memory_space<semaphore_mem>>) attributes {dimension_semantics = [], scalar_prefetch = 0 : i64, scratch_operands = 1 : i64, tpu.core_type = #tpu.core_type<tc>} {
    %c0_i32 = arith.constant 0 : i32
    %0 = tpu.memref_slice %arg2[%c0_i32] : memref<1x!tpu.dma_semaphore, #tpu.memory_space<semaphore_mem>> -> memref<1x!tpu.dma_semaphore, #tpu.memory_space<semaphore_mem>>
    %1 = tpu.memref_squeeze %0 : memref<1x!tpu.dma_semaphore, #tpu.memory_space<semaphore_mem>> -> memref<!tpu.dma_semaphore, #tpu.memory_space<semaphore_mem>>
    tpu.enqueue_dma source(%arg0 : memref<256x128xf32, #tpu.memory_space<any>>) target(%arg1 : memref<256x128xf32, #tpu.memory_space<any>>) target_semaphore(%1 : memref<!tpu.dma_semaphore, #tpu.memory_space<semaphore_mem>>)
    %c0_i32_0 = arith.constant 0 : i32
    %2 = tpu.memref_slice %arg2[%c0_i32_0] : memref<1x!tpu.dma_semaphore, #tpu.memory_space<semaphore_mem>> -> memref<1x!tpu.dma_semaphore, #tpu.memory_space<semaphore_mem>>
    %3 = tpu.memref_squeeze %2 : memref<1x!tpu.dma_semaphore, #tpu.memory_space<semaphore_mem>> -> memref<!tpu.dma_semaphore, #tpu.memory_space<semaphore_mem>>
    tpu.wait_dma2 semaphore(%3 : memref<!tpu.dma_semaphore, #tpu.memory_space<semaphore_mem>>) src(%arg0 : memref<256x128xf32, #tpu.memory_space<any>>) dst(%arg1 : memref<256x128xf32, #tpu.memory_space<any>>)
    return
  }
}

</mosaic_0001>

<bundles_post_ra>
// kernel: tpu_custom_call.1
= control target key start
LH: loop header
LB: loop body
LE: loop exit
PB: predicated region body
PF: predicated region fallthrough
CT: control target
= control target key end

     0   :  { %s28_s6 = smov [#allocation2]   ;;  %s29_s7 = smov 131072   ;;  %s47_s0 = inlined_call_operand.hbm [shape: f32[256,128], index: 0, kind: input, shape index: {}]   ;;  %s48_s1 = inlined_call_operand.hbm [shape: f32[256,128], index: 1, kind: output, shape index: {}]  }
   0x1   :  { %s30_s8 = smov 0  }
   0x2   :  { %12 = dma.general %s47_s0, 4096, %s48_s1, %s28_s6, %s29_s7, [#allocation4], %s30_s8, 0  }
   0x3   :  { %26 = dma.done.wait [#allocation2], 4096 }
   0x4   :  { %27 = vsyncadd [#allocation2], 4294963200 }
   0x5   :  { %16 = vsyncmov [#allocation2] }
   0x8   :  { %s17_s13 = vpop.sfrf %16 }
   0x9   :  { %p22_p0 = scmp.ne.s32.totalorder %s17_s13, 0 }
   0xb   :  { %21 = shalt.err (%p22_p0)  }

</bundles_post_ra>
